<compile_context>
chip_gen: v5e
topology: v5e:2x2
jax: 0.10.0
libtpu: 0.0.40
codegen_flags: <defaults>
</compile_context>

<pallas_src>
import jax
import jax.numpy as jnp
from jax.experimental import pallas as pl
from jax.experimental.pallas import tpu as pltpu


# ----------------------------------------------------------------------------
# Small helpers
# ----------------------------------------------------------------------------
def _round_up(x, m):
    return ((x + m - 1) // m) * m


def _vmem_capacity_bytes():
    try:
        cap = int(getattr(pltpu.get_tpu_info(), "vmem_capacity_bytes"))
        if cap > 0:
            return cap
    except Exception:
        pass
    return 64 * 2**20  # conservative fallback (v7x per-core VMEM)


def _compiler_params(sems, vmem_est=None):
    kw = dict(dimension_semantics=sems)
    # Only raise the scoped-VMEM limit when the estimate exceeds the most
    # conservative default; cap at ~0.8x of the physical per-core VMEM.
    if vmem_est is not None and vmem_est > 16 * 2**20:
        cap = int(0.8 * _vmem_capacity_bytes())
        kw["vmem_limit_bytes"] = int(min(int(vmem_est), cap))
    return pltpu.CompilerParams(**kw)


def _pad2(a, rows, cols):
    r, c = a.shape
    if r == rows and c == cols:
        return a
    return jnp.pad(a, ((0, rows - r), (0, cols - c)))


# ----------------------------------------------------------------------------
# Kernel 1: three-NN interpolation, tiled over (batch, N-tile).
# ----------------------------------------------------------------------------
def _interp_kernel(x1_ref, x2t_ref, p2_ref, out_ref):
    x1 = x1_ref[0].astype(jnp.float32)    # (TN, 3)
    x2t = x2t_ref[0].astype(jnp.float32)  # (3, M)
    p2 = p2_ref[0].astype(jnp.float32)    # (M, C2p)
    tn = x1.shape[0]
    m = x2t.shape[1]

    # Squared pairwise distances via unrolled per-coordinate (a-b)^2 on the
    # VPU (no K=3 MXU matmul, no ||a||^2+||b||^2-2ab cancellation).
    d2 = jnp.zeros((tn, m), jnp.float32)
    for c in range(3):
        diff = x1[:, c:c + 1] - x2t[c:c + 1, :]
        d2 = d2 + diff * diff

    col = jax.lax.broadcasted_iota(jnp.int32, (tn, m), 1)
    big = jnp.float32(3e38)

    work = d2
    w_unnorm = jnp.zeros((tn, m), jnp.float32)
    norm = jnp.zeros((tn, 1), jnp.float32)
    # Pick the 3 nearest neighbors (first-occurrence argmin, then mask out).
    # Selection is on squared distance (monotone); sqrt only on (TN, 1) minima.
    # The min + first-occurrence pair is kept (2 XLU reduces/neighbor) to match
    # PyTorch tie-breaking exactly; the former (TN,M) row-sum + divide are gone.
    for _ in range(3):
        d2min = jnp.min(work, axis=-1, keepdims=True)             # (TN, 1)
        cand = jnp.where(work <= d2min, col, jnp.int32(m))
        amin = jnp.min(cand, axis=-1, keepdims=True)              # first occurrence
        onehot = (col == amin).astype(jnp.float32)                # (TN, M)
        dist = jnp.sqrt(jnp.maximum(d2min, 0.0))                  # (TN, 1)
        recip = 1.0 / (dist + 1e-8)
        w_unnorm = w_unnorm + recip * onehot
        norm = norm + recip
        work = jnp.where(col == amin, big, work)

    out = jnp.dot(w_unnorm, p2, preferred_element_type=jnp.float32)  # (TN, C2p)
    out = out * (1.0 / norm)          # per-row normalization after the matmul
    out_ref[0] = out.astype(out_ref.dtype)


def three_interpolate(xyz1, xyz2, points2):
    """Returns (B, N, C2p) with C2p = round_up(C2, 128); padded channels are 0."""
    B, N, _ = xyz1.shape
    _, M, _ = xyz2.shape
    C2 = points2.shape[-1]
    C2p = _round_up(C2, 128)
    if C2p != C2:
        points2 = jnp.pad(points2, ((0, 0), (0, 0), (0, C2p - C2)))

    # VMEM-budgeted N tile (generation-aware); pad N up to a multiple of it
    # instead of shrinking the tile to a divisor of N.
    cap = _vmem_capacity_bytes()
    budget = int(0.45 * cap)
    fixed = 4 * (2 * 3 * M + 2 * M * C2p)            # x2t + p2 blocks (2x buffered)
    per_row = 4 * (6 * M + 2 * 3 + 2 * C2p)          # (TN,M) temporaries + x1/out blocks
    tn = (budget - fixed) // max(per_row, 1)
    tn = max(8, min(512, (tn // 8) * 8))
    tn = min(tn, _round_up(N, 8))
    Np = _round_up(N, tn)
    if Np != N:
        xyz1 = jnp.pad(xyz1, ((0, 0), (0, Np - N), (0, 0)))

    xyz2_t = jnp.swapaxes(xyz2, 1, 2)  # (B, 3, M) -> avoid in-kernel transpose
    vmem_est = fixed + per_row * tn + (2 << 20)

    out = pl.pallas_call(
        _interp_kernel,
        out_shape=jax.ShapeDtypeStruct((B, Np, C2p), jnp.float32),
        grid=(B, Np // tn),
        in_specs=[
            pl.BlockSpec((1, tn, 3), lambda b, n: (b, n, 0)),
            pl.BlockSpec((1, 3, M), lambda b, n: (b, 0, 0)),
            pl.BlockSpec((1, M, C2p), lambda b, n: (b, 0, 0)),
        ],
        out_specs=pl.BlockSpec((1, tn, C2p), lambda b, n: (b, n, 0)),
        compiler_params=_compiler_params(("parallel", "parallel"), vmem_est),
    )(xyz1, xyz2_t, points2)
    return out if Np == N else out[:, :N, :]


# ----------------------------------------------------------------------------
# Kernel 2: fused MLP layer.
#   x = [relu(y_prev * scale + shift)]   (BN+ReLU of previous layer, fused in)
#   y = x @ W                            (MXU, f32 accumulate)
#   per-tile partial sum / sumsq of y    (row 0 / row 1 of an 8-row group)
# Layer 0 skips the BN+ReLU prologue and may take two input slabs (fused
# channel concat via split weights).
# ----------------------------------------------------------------------------
def _write_stats(stats_ref, y):
    c = y.shape[1]
    s = jnp.sum(y, axis=0, keepdims=True)           # (1, C) partial sum
    ss = jnp.sum(y * y, axis=0, keepdims=True)      # (1, C) partial sum of squares
    row = jax.lax.broadcasted_iota(jnp.int32, (8, c), 0)
    sb = jnp.broadcast_to(s, (8, c))
    ssb = jnp.broadcast_to(ss, (8, c))
    stats_ref[0] = jnp.where(row == 0, sb, jnp.where(row == 1, ssb, 0.0))


def _make_matmul_stats_kernel(n_in, fuse_bn, p_valid, tp):
    def kernel(*refs):
        i = 0
        x_refs = refs[i:i + n_in]; i += n_in
        if fuse_bn:
            scale_ref, shift_ref = refs[i], refs[i + 1]; i += 2
        w_refs = refs[i:i + n_in]; i += n_in
        y_ref, stats_ref = refs[i], refs[i + 1]

        def load(k):
            x = x_refs[k][...].astype(jnp.float32)
            if fuse_bn:
                x = jnp.maximum(x * scale_ref[...] + shift_ref[...], 0.0)
                if p_valid is not None:
                    # Padded rows must be exactly zero so they don't pollute
                    # this layer's batch statistics.
                    # TODO(synk): gate the select to the last tile only.
                    r = pl.program_id(0) * tp + jax.lax.broadcasted_iota(
                        jnp.int32, x.shape, 0)
                    x = jnp.where(r < p_valid, x, 0.0)
            return x

        y = jnp.dot(load(0), w_refs[0][...].astype(jnp.float32),
                    preferred_element_type=jnp.float32)
        for k in range(1, n_in):
            y = y + jnp.dot(load(k), w_refs[k][...].astype(jnp.float32),
                            preferred_element_type=jnp.float32)
        y_ref[...] = y.astype(y_ref.dtype)
        _write_stats(stats_ref, y)

    return kernel


def _mlp_layer(xs, wts, tp, *, scale=None, shift=None, p_valid=None):
    """One (fused) MLP layer.  Returns (y, stats) where y is the pre-BN output
    slab (P_pad, Cout) and stats is (num_tiles, 8, Cout) with row 0 = partial
    sum and row 1 = partial sum of squares of each tile (rows 2..7 zero)."""
    fuse_bn = scale is not None
    n_in = len(xs)
    p_pad = xs[0].shape[0]
    c_out = wts[0].shape[1]
    nt = p_pad // tp

    operands = list(xs)
    in_specs = [pl.BlockSpec((tp, x.shape[1]), lambda i: (i, 0)) for x in xs]
    if fuse_bn:
        c_in = xs[0].shape[1]
        operands += [scale, shift]
        in_specs += [pl.BlockSpec((1, c_in), lambda i: (0, 0)),
                     pl.BlockSpec((1, c_in), lambda i: (0, 0))]
    operands += list(wts)
    in_specs += [pl.BlockSpec(w.shape, lambda i: (0, 0)) for w in wts]  # resident

    out_specs = [pl.BlockSpec((tp, c_out), lambda i: (i, 0)),
                 pl.BlockSpec((1, 8, c_out), lambda i: (i, 0, 0))]
    out_shape = [jax.ShapeDtypeStruct((p_pad, c_out), jnp.float32),
                 jax.ShapeDtypeStruct((nt, 8, c_out), jnp.float32)]

    cin_total = sum(int(x.shape[1]) for x in xs)
    vmem_est = 4 * (2 * tp * cin_total + 2 * tp * c_out
                    + 2 * cin_total * c_out + 4 * cin_total + 32 * c_out) + (2 << 20)

    return pl.pallas_call(
        _make_matmul_stats_kernel(n_in, fuse_bn, p_valid, tp),
        grid=(nt,),
        in_specs=in_specs,
        out_specs=out_specs,
        out_shape=out_shape,
        compiler_params=_compiler_params(("parallel",), vmem_est),
    )(*operands)


# ----------------------------------------------------------------------------
# Kernel 3: standalone BN-affine + ReLU epilogue (last layer only).
# ----------------------------------------------------------------------------
def _final_kernel(y_ref, scale_ref, shift_ref, out_ref):
    out_ref[...] = jnp.maximum(
        y_ref[...].astype(jnp.float32) * scale_ref[...] + shift_ref[...], 0.0
    ).astype(out_ref.dtype)


def _mlp_final(y, scale, shift, tp):
    p_pad, c_out = y.shape
    vmem_est = 4 * (4 * tp * c_out + 4 * c_out) + (2 << 20)
    return pl.pallas_call(
        _final_kernel,
        grid=(p_pad // tp,),
        in_specs=[
            pl.BlockSpec((tp, c_out), lambda i: (i, 0)),
            pl.BlockSpec((1, c_out), lambda i: (0, 0)),
            pl.BlockSpec((1, c_out), lambda i: (0, 0)),
        ],
        out_specs=pl.BlockSpec((tp, c_out), lambda i: (i, 0)),
        out_shape=jax.ShapeDtypeStruct((p_pad, c_out), jnp.float32),
        compiler_params=_compiler_params(("parallel",), vmem_est),
    )(y, scale, shift)


# ----------------------------------------------------------------------------
# Module wrapper
# ----------------------------------------------------------------------------
def init_params(key, in_channel, mlp):
    """Deterministic parameters per layer: Conv1d weight (Cout, Cin) and
    BatchNorm1d gamma/beta.  The conv bias is omitted because training-mode BN
    subtracts the batch mean immediately afterwards, so it cancels exactly."""
    params = []
    c_in = in_channel
    for c_out in mlp:
        key, k_w, k_g, k_be = jax.random.split(key, 4)
        w = jax.random.normal(k_w, (c_out, c_in), jnp.float32) * (1.0 / jnp.sqrt(c_in))
        gamma = 1.0 + 0.1 * jax.random.normal(k_g, (c_out,), jnp.float32)
        beta = 0.1 * jax.random.normal(k_be, (c_out,), jnp.float32)
        params.append(dict(w=w, gamma=gamma, beta=beta))
        c_in = c_out
    return params


def _bn_affine(stats, gamma, beta, inv_p, eps):
    """Fold full-batch training-mode BN stats into a per-channel affine.
    Padded channels have gamma = beta = 0, so scale = shift = 0 there."""
    coutp = stats.shape[-1]
    s = jnp.sum(stats[:, 0, :], axis=0, keepdims=True)   # (1, Coutp)
    ss = jnp.sum(stats[:, 1, :], axis=0, keepdims=True)  # (1, Coutp)
    mean = s * inv_p
    var = jnp.maximum(ss * inv_p - mean * mean, 0.0)
    g = jnp.pad(gamma.astype(jnp.float32).reshape(1, -1),
                ((0, 0), (0, coutp - gamma.shape[-1])))
    b = jnp.pad(beta.astype(jnp.float32).reshape(1, -1),
                ((0, 0), (0, coutp - beta.shape[-1])))
    scale = g * jax.lax.rsqrt(var + eps)
    shift = b - mean * scale
    return scale, shift


def pointnet_fp_forward(params, xyz1, xyz2, points1, points2, *, bn_eps=1e-5):
    B, N, _ = xyz1.shape
    _, M, _ = xyz2.shape
    C2 = points2.shape[-1]
    C2p = _round_up(C2, 128)

    if M == 1:
        # torch: points2.repeat(1, N, 1)
        interpolated = jnp.broadcast_to(points2, (B, N, C2)).astype(jnp.float32)
    else:
        interpolated = three_interpolate(xyz1, xyz2, points2)   # (B, N, C2p)

    p_true = B * N
    inv_p = 1.0 / p_true

    if points1 is not None:
        C1 = points1.shape[-1]
        C1p = _round_up(C1, 128)
    else:
        C1, C1p = 0, 0

    # Padded channel widths per layer (lane-dense, 128-multiples everywhere).
    widths = []
    cin_p = (C1p + C2p) if points1 is not None else C2p
    for layer in params:
        coutp = _round_up(layer["w"].shape[0], 128)
        widths.append((cin_p, coutp))
        cin_p = coutp

    # Single row-tile tp for all MLP kernels, sized against the VMEM budget of
    # the widest layer (input + output tiles double-buffered + resident weight).
    budget = int(0.45 * _vmem_capacity_bytes())

    def _fits(tp_):
        for ci, co in widths:
            need = 4 * (2 * tp_ * ci + 2 * tp_ * co + 2 * ci * co + 40 * co) + (2 << 20)
            if need > budget:
                return False
        return True

    tp = min(2048, _round_up(p_true, 8))
    while tp > 8 and not _fits(tp):
        tp = max(8, _round_up(tp // 2, 8))
    p_pad = _round_up(p_true, tp)
    p_valid = None if p_pad == p_true else p_true

    def _flat(a, cp):
        c = a.shape[-1]
        a2 = a.reshape(p_true, c).astype(jnp.float32)
        pad_r, pad_c = p_pad - p_true, cp - c
        if pad_r or pad_c:
            a2 = jnp.pad(a2, ((0, pad_r), (0, pad_c)))
        return a2

    # ---- layer 0: channel concat fused via split weights ----
    w0 = jnp.asarray(params[0]["w"], jnp.float32)   # (Cout0, C1 + C2)
    cout0p = widths[0][1]
    w0_t = w0.T                                     # (C1 + C2, Cout0)
    if points1 is not None:
        xs0 = [_flat(points1, C1p), _flat(interpolated, C2p)]
        wts0 = [_pad2(w0_t[:C1], C1p, cout0p), _pad2(w0_t[C1:], C2p, cout0p)]
    else:
        xs0 = [_flat(interpolated, C2p)]
        wts0 = [_pad2(w0_t, C2p, cout0p)]

    y, stats = _mlp_layer(xs0, wts0, tp)
    scale, shift = _bn_affine(stats, params[0]["gamma"], params[0]["beta"],
                              inv_p, bn_eps)

    # ---- layers 1..L-1: BN+ReLU of layer i-1 fused into matmul of layer i ----
    cin_p = cout0p
    for li in range(1, len(params)):
        layer = params[li]
        coutp = widths[li][1]
        w_t = _pad2(jnp.asarray(layer["w"], jnp.float32).T, cin_p, coutp)
        y, stats = _mlp_layer([y], [w_t], tp, scale=scale, shift=shift,
                              p_valid=p_valid)
        scale, shift = _bn_affine(stats, layer["gamma"], layer["beta"],
                                  inv_p, bn_eps)
        cin_p = coutp

    # ---- final BN+ReLU epilogue ----
    out = _mlp_final(y, scale, shift, tp)
    out = out[:p_true, :params[-1]["w"].shape[0]]
    return out.reshape(B, N, -1)


if __name__ == "__main__":
    # Small shapes: B=2, N=16 dense points, M=8 sparse points,
    # C1=8 (points1 channels), C2=16 (points2 channels), mlp=[32, 16].
    B, N, M, C1, C2 = 2, 16, 8, 8, 16
    in_channel = C1 + C2
    mlp = [32, 16]

    key = jax.random.PRNGKey(0)
    k1, k2, k3, k4, k5 = jax.random.split(key, 5)
    xyz1 = jax.random.normal(k1, (B, N, 3), jnp.float32)
    xyz2 = jax.random.normal(k2, (B, M, 3), jnp.float32)
    points1 = jax.random.normal(k3, (B, N, C1), jnp.float32)
    points2 = jax.random.normal(k4, (B, M, C2), jnp.float32)

    params = init_params(k5, in_channel, mlp)

    out = pointnet_fp_forward(params, xyz1, xyz2, points1, points2)
    jax.block_until_ready(out)
    assert out.shape == (B, N, mlp[-1]), out.shape
    print("KERNEL_OK")
</pallas_src>

<mosaic_0001>
module attributes {stable_mosaic.version = 11 : i64} {
  func.func @_interp_kernel(%arg0: i32, %arg1: i32, %arg2: memref<1x16x3xf32, #tpu.memory_space<vmem>>, %arg3: memref<1x3x8xf32, #tpu.memory_space<vmem>>, %arg4: memref<1x8x128xf32, #tpu.memory_space<vmem>>, %arg5: memref<1x16x128xf32, #tpu.memory_space<vmem>>) attributes {dimension_semantics = [#tpu.dimension_semantics<parallel>, #tpu.dimension_semantics<parallel>], iteration_bounds = array<i64: 2, 1>, scalar_prefetch = 0 : i64, scratch_operands = 0 : i64, tpu.core_type = #tpu.core_type<tc>, window_params = [{transform_indices = @transform_0, window_bounds = array<i64: 1, 16, 3>}, {transform_indices = @transform_1, window_bounds = array<i64: 1, 3, 8>}, {transform_indices = @transform_2, window_bounds = array<i64: 1, 8, 128>}, {transform_indices = @transform_3, window_bounds = array<i64: 1, 16, 128>}]} {
    %c0 = arith.constant 0 : index
    %c0_0 = arith.constant 0 : index
    %c0_1 = arith.constant 0 : index
    %0 = vector.load %arg2[%c0, %c0_0, %c0_1] : memref<1x16x3xf32, #tpu.memory_space<vmem>>, vector<1x16x3xf32>
    %1 = vector.shape_cast %0 : vector<1x16x3xf32> to vector<16x3xf32>
    %c0_2 = arith.constant 0 : index
    %c0_3 = arith.constant 0 : index
    %c0_4 = arith.constant 0 : index
    %2 = vector.load %arg3[%c0_2, %c0_3, %c0_4] : memref<1x3x8xf32, #tpu.memory_space<vmem>>, vector<1x3x8xf32>
    %3 = vector.shape_cast %2 : vector<1x3x8xf32> to vector<3x8xf32>
    %c0_5 = arith.constant 0 : index
    %c0_6 = arith.constant 0 : index
    %c0_7 = arith.constant 0 : index
    %4 = vector.load %arg4[%c0_5, %c0_6, %c0_7] : memref<1x8x128xf32, #tpu.memory_space<vmem>>, vector<1x8x128xf32>
    %5 = vector.shape_cast %4 : vector<1x8x128xf32> to vector<8x128xf32>
    %cst = arith.constant 0.000000e+00 : f32
    %6 = vector.broadcast %cst : f32 to vector<16x8xf32>
    %7 = vector.extract_strided_slice %1 {offsets = [0, 0], sizes = [16, 1], strides = [1, 1]} : vector<16x3xf32> to vector<16x1xf32>
    %8 = vector.extract_strided_slice %3 {offsets = [0, 0], sizes = [1, 8], strides = [1, 1]} : vector<3x8xf32> to vector<1x8xf32>
    %9 = vector.broadcast %7 : vector<16x1xf32> to vector<16x8xf32>
    %10 = vector.broadcast %8 : vector<1x8xf32> to vector<16x8xf32>
    %11 = arith.subf %9, %10 : vector<16x8xf32>
    %12 = arith.mulf %11, %11 : vector<16x8xf32>
    %13 = arith.addf %6, %12 : vector<16x8xf32>
    %14 = vector.extract_strided_slice %1 {offsets = [0, 1], sizes = [16, 1], strides = [1, 1]} : vector<16x3xf32> to vector<16x1xf32>
    %15 = vector.extract_strided_slice %3 {offsets = [1, 0], sizes = [1, 8], strides = [1, 1]} : vector<3x8xf32> to vector<1x8xf32>
    %16 = vector.broadcast %14 : vector<16x1xf32> to vector<16x8xf32>
    %17 = vector.broadcast %15 : vector<1x8xf32> to vector<16x8xf32>
    %18 = arith.subf %16, %17 : vector<16x8xf32>
    %19 = arith.mulf %18, %18 : vector<16x8xf32>
    %20 = arith.addf %13, %19 : vector<16x8xf32>
    %21 = vector.extract_strided_slice %1 {offsets = [0, 2], sizes = [16, 1], strides = [1, 1]} : vector<16x3xf32> to vector<16x1xf32>
    %22 = vector.extract_strided_slice %3 {offsets = [2, 0], sizes = [1, 8], strides = [1, 1]} : vector<3x8xf32> to vector<1x8xf32>
    %23 = vector.broadcast %21 : vector<16x1xf32> to vector<16x8xf32>
    %24 = vector.broadcast %22 : vector<1x8xf32> to vector<16x8xf32>
    %25 = arith.subf %23, %24 : vector<16x8xf32>
    %26 = arith.mulf %25, %25 : vector<16x8xf32>
    %27 = arith.addf %20, %26 : vector<16x8xf32>
    %28 = tpu.iota {dimensions = array<i32: 1>} : vector<16x8xi32>
    %cst_8 = arith.constant 0.000000e+00 : f32
    %29 = vector.broadcast %cst_8 : f32 to vector<16x8xf32>
    %cst_9 = arith.constant 0.000000e+00 : f32
    %30 = vector.broadcast %cst_9 : f32 to vector<16x1xf32>
    %cst_10 = arith.constant dense<0x7F800000> : vector<16xf32>
    %31 = vector.multi_reduction <minimumf>, %27, %cst_10 [1] : vector<16x8xf32> to vector<16xf32>
    %32 = vector.shape_cast %31 : vector<16xf32> to vector<16x1xf32>
    %33 = vector.broadcast %32 : vector<16x1xf32> to vector<16x8xf32>
    %34 = arith.cmpf ole, %27, %33 : vector<16x8xf32>
    %c8_i32 = arith.constant 8 : i32
    %35 = vector.broadcast %c8_i32 : i32 to vector<16x8xi32>
    %36 = arith.select %34, %28, %35 : vector<16x8xi1>, vector<16x8xi32>
    %cst_11 = arith.constant dense<2147483647> : vector<16xi32>
    %37 = vector.multi_reduction <minsi>, %36, %cst_11 [1] : vector<16x8xi32> to vector<16xi32>
    %38 = vector.shape_cast %37 : vector<16xi32> to vector<16x1xi32>
    %39 = vector.broadcast %38 : vector<16x1xi32> to vector<16x8xi32>
    %40 = arith.cmpi eq, %28, %39 : vector<16x8xi32>
    %41 = arith.extui %40 : vector<16x8xi1> to vector<16x8xi32>
    %42 = arith.sitofp %41 : vector<16x8xi32> to vector<16x8xf32>
    %cst_12 = arith.constant 0.000000e+00 : f32
    %43 = vector.broadcast %cst_12 : f32 to vector<16x1xf32>
    %44 = arith.maximumf %32, %43 : vector<16x1xf32>
    %45 = math.sqrt %44 : vector<16x1xf32>
    %cst_13 = arith.constant 9.99999993E-9 : f32
    %46 = vector.broadcast %cst_13 : f32 to vector<16x1xf32>
    %47 = arith.addf %45, %46 : vector<16x1xf32>
    %cst_14 = arith.constant 1.000000e+00 : f32
    %48 = vector.broadcast %cst_14 : f32 to vector<16x1xf32>
    %49 = arith.divf %48, %47 : vector<16x1xf32>
    %50 = vector.broadcast %49 : vector<16x1xf32> to vector<16x8xf32>
    %51 = arith.mulf %50, %42 : vector<16x8xf32>
    %52 = arith.addf %29, %51 : vector<16x8xf32>
    %53 = arith.addf %30, %49 : vector<16x1xf32>
    %54 = vector.broadcast %38 : vector<16x1xi32> to vector<16x8xi32>
    %55 = arith.cmpi eq, %28, %54 : vector<16x8xi32>
    %cst_15 = arith.constant 3.000000e+38 : f32
    %56 = vector.broadcast %cst_15 : f32 to vector<16x8xf32>
    %57 = arith.select %55, %56, %27 : vector<16x8xi1>, vector<16x8xf32>
    %cst_16 = arith.constant dense<0x7F800000> : vector<16xf32>
    %58 = vector.multi_reduction <minimumf>, %57, %cst_16 [1] : vector<16x8xf32> to vector<16xf32>
    %59 = vector.shape_cast %58 : vector<16xf32> to vector<16x1xf32>
    %60 = vector.broadcast %59 : vector<16x1xf32> to vector<16x8xf32>
    %61 = arith.cmpf ole, %57, %60 : vector<16x8xf32>
    %c8_i32_17 = arith.constant 8 : i32
    %62 = vector.broadcast %c8_i32_17 : i32 to vector<16x8xi32>
    %63 = arith.select %61, %28, %62 : vector<16x8xi1>, vector<16x8xi32>
    %cst_18 = arith.constant dense<2147483647> : vector<16xi32>
    %64 = vector.multi_reduction <minsi>, %63, %cst_18 [1] : vector<16x8xi32> to vector<16xi32>
    %65 = vector.shape_cast %64 : vector<16xi32> to vector<16x1xi32>
    %66 = vector.broadcast %65 : vector<16x1xi32> to vector<16x8xi32>
    %67 = arith.cmpi eq, %28, %66 : vector<16x8xi32>
    %68 = arith.extui %67 : vector<16x8xi1> to vector<16x8xi32>
    %69 = arith.sitofp %68 : vector<16x8xi32> to vector<16x8xf32>
    %cst_19 = arith.constant 0.000000e+00 : f32
    %70 = vector.broadcast %cst_19 : f32 to vector<16x1xf32>
    %71 = arith.maximumf %59, %70 : vector<16x1xf32>
    %72 = math.sqrt %71 : vector<16x1xf32>
    %cst_20 = arith.constant 9.99999993E-9 : f32
    %73 = vector.broadcast %cst_20 : f32 to vector<16x1xf32>
    %74 = arith.addf %72, %73 : vector<16x1xf32>
    %cst_21 = arith.constant 1.000000e+00 : f32
    %75 = vector.broadcast %cst_21 : f32 to vector<16x1xf32>
    %76 = arith.divf %75, %74 : vector<16x1xf32>
    %77 = vector.broadcast %76 : vector<16x1xf32> to vector<16x8xf32>
    %78 = arith.mulf %77, %69 : vector<16x8xf32>
    %79 = arith.addf %52, %78 : vector<16x8xf32>
    %80 = arith.addf %53, %76 : vector<16x1xf32>
    %81 = vector.broadcast %65 : vector<16x1xi32> to vector<16x8xi32>
    %82 = arith.cmpi eq, %28, %81 : vector<16x8xi32>
    %cst_22 = arith.constant 3.000000e+38 : f32
    %83 = vector.broadcast %cst_22 : f32 to vector<16x8xf32>
    %84 = arith.select %82, %83, %57 : vector<16x8xi1>, vector<16x8xf32>
    %cst_23 = arith.constant dense<0x7F800000> : vector<16xf32>
    %85 = vector.multi_reduction <minimumf>, %84, %cst_23 [1] : vector<16x8xf32> to vector<16xf32>
    %86 = vector.shape_cast %85 : vector<16xf32> to vector<16x1xf32>
    %87 = vector.broadcast %86 : vector<16x1xf32> to vector<16x8xf32>
    %88 = arith.cmpf ole, %84, %87 : vector<16x8xf32>
    %c8_i32_24 = arith.constant 8 : i32
    %89 = vector.broadcast %c8_i32_24 : i32 to vector<16x8xi32>
    %90 = arith.select %88, %28, %89 : vector<16x8xi1>, vector<16x8xi32>
    %cst_25 = arith.constant dense<2147483647> : vector<16xi32>
    %91 = vector.multi_reduction <minsi>, %90, %cst_25 [1] : vector<16x8xi32> to vector<16xi32>
    %92 = vector.shape_cast %91 : vector<16xi32> to vector<16x1xi32>
    %93 = vector.broadcast %92 : vector<16x1xi32> to vector<16x8xi32>
    %94 = arith.cmpi eq, %28, %93 : vector<16x8xi32>
    %95 = arith.extui %94 : vector<16x8xi1> to vector<16x8xi32>
    %96 = arith.sitofp %95 : vector<16x8xi32> to vector<16x8xf32>
    %cst_26 = arith.constant 0.000000e+00 : f32
    %97 = vector.broadcast %cst_26 : f32 to vector<16x1xf32>
    %98 = arith.maximumf %86, %97 : vector<16x1xf32>
    %99 = math.sqrt %98 : vector<16x1xf32>
    %cst_27 = arith.constant 9.99999993E-9 : f32
    %100 = vector.broadcast %cst_27 : f32 to vector<16x1xf32>
    %101 = arith.addf %99, %100 : vector<16x1xf32>
    %cst_28 = arith.constant 1.000000e+00 : f32
    %102 = vector.broadcast %cst_28 : f32 to vector<16x1xf32>
    %103 = arith.divf %102, %101 : vector<16x1xf32>
    %104 = vector.broadcast %103 : vector<16x1xf32> to vector<16x8xf32>
    %105 = arith.mulf %104, %96 : vector<16x8xf32>
    %106 = arith.addf %79, %105 : vector<16x8xf32>
    %107 = arith.addf %80, %103 : vector<16x1xf32>
    %cst_29 = arith.constant dense<0.000000e+00> : vector<16x128xf32>
    %108 = tpu.matmul %106, %5, %cst_29 {dimension_numbers = #tpu.dot_dimension_numbers<[1], [0], [0], [1], [0, 0, 1, 1], [], []>} : vector<16x8xf32>, vector<8x128xf32>, vector<16x128xf32> -> vector<16x128xf32>
    %cst_30 = arith.constant 1.000000e+00 : f32
    %109 = vector.broadcast %cst_30 : f32 to vector<16x1xf32>
    %110 = arith.divf %109, %107 : vector<16x1xf32>
    %111 = vector.broadcast %110 : vector<16x1xf32> to vector<16x128xf32>
    %112 = arith.mulf %108, %111 : vector<16x128xf32>
    %c0_31 = arith.constant 0 : index
    %c0_32 = arith.constant 0 : index
    %c0_33 = arith.constant 0 : index
    %113 = vector.load %arg5[%c0_31, %c0_32, %c0_33] : memref<1x16x128xf32, #tpu.memory_space<vmem>>, vector<1x16x128xf32>
    %114 = vector.shape_cast %113 : vector<1x16x128xf32> to vector<16x128xf32>
    %115 = vector.shape_cast %112 : vector<16x128xf32> to vector<1x16x128xf32>
    tpu.vector_store %arg5[%c0_31, %c0_32, %c0_33], %115 {strides = array<i32>} : memref<1x16x128xf32, #tpu.memory_space<vmem>>, vector<1x16x128xf32>,
    return
  }
  func.func @transform_0(%arg0: i32, %arg1: i32) -> (i32, i32, i32) {
    %c0_i32 = arith.constant 0 : i32
    %c0_i32_0 = arith.constant 0 : i32
    return %arg0, %arg1, %c0_i32 : i32, i32, i32
  }
  func.func @transform_1(%arg0: i32, %arg1: i32) -> (i32, i32, i32) {
    %c0_i32 = arith.constant 0 : i32
    %c0_i32_0 = arith.constant 0 : i32
    %c0_i32_1 = arith.constant 0 : i32
    return %arg0, %c0_i32, %c0_i32_0 : i32, i32, i32
  }
  func.func @transform_2(%arg0: i32, %arg1: i32) -> (i32, i32, i32) {
    %c0_i32 = arith.constant 0 : i32
    %c0_i32_0 = arith.constant 0 : i32
    %c0_i32_1 = arith.constant 0 : i32
    return %arg0, %c0_i32, %c0_i32_0 : i32, i32, i32
  }
  func.func @transform_3(%arg0: i32, %arg1: i32) -> (i32, i32, i32) {
    %c0_i32 = arith.constant 0 : i32
    %c0_i32_0 = arith.constant 0 : i32
    return %arg0, %arg1, %c0_i32 : i32, i32, i32
  }
}

</mosaic_0001>

<bundles_post_ra>
// kernel: tpu_custom_call.1
= control target key start
LH: loop header
LB: loop body
LE: loop exit
PB: predicated region body
PF: predicated region fallthrough
CT: control target
= control target key end

     0   :  { %8 = vsyncpa [#allocation3], 0  ;;  %s1297_s0 = inlined_call_operand.vmem [shape: f32[2,16,3], index: 0, kind: input, shape index: {}]   ;;  %s1298_s1 = inlined_call_operand.vmem [shape: f32[2,3,8], index: 1, kind: input, shape index: {}]   ;;  %s1299_s2 = inlined_call_operand.vmem [shape: f32[2,8,128], index: 2, kind: input, shape index: {}]   ;;  %s1300_s3 = inlined_call_operand.hbm [shape: f32[2,16,128], index: 3, kind: output, shape index: {}]  }
   0x1   :  { %10 = vsyncpa [#allocation3 + $0x1], 0  ;;  %s1031_s12 = smov 0   ;;  %s1033_s13 = smov 0  }
   0x2   :  { %s1035_s14 = smov 0   ;;  %s1037_s15 = smov 0  }
   0x3   :  { %s1039_s16 = smov 0   ;;  %s1041_s17 = smov 0  }
   0x4 LB: > { %s806_s18 = sadd.s32 4294967295, %s1003_s17   ;;  %s807_s19 = sadd.s32 4294967294, %s1003_s17   ;;  %s1003_s17 = sphi %s1041_s17, %s16_s17   ;;  %s999_s16 = sphi %s1039_s16, %s1313_s16   ;;  %s995_s15 = sphi %s1037_s15, %s1312_s15   ;;  %s991_s14 = sphi %s1035_s14, %s1311_s14   ;;  %s987_s13 = sphi %s1033_s13, %s1310_s13   ;;  %s983_s12 = sphi %s1031_s12, %s1309_s12  }
   0x5   : > { %s28_s20 = sadd.s32 1, %s999_s16  ;;  %s117_s21 = sadd.s32 1, %s991_s14 }
   0x6   : > { %p30_p0 = scmp.ge.s32.totalorder %s28_s20, 2  ;;  %p127_p1 = scmp.ne.s32.totalorder %s991_s14, %s987_s13 }
   0x7   : > { %p128_p2 = scmp.eq.s32.totalorder %s806_s18, 1  ;;  %p133_p3 = scmp.ne.s32.totalorder %s987_s13, %s983_s12 }
   0x8   : > { %s1315_s20 = smov (%p30_p0, %s28_s20), 0  ;;  %p134_p5 = scmp.eq.s32.totalorder %s807_s19, 1 }
   0x9   : > { %p1071_p4 = por %p128_p2, %p127_p1  ;;  %s112_s23 = ssub.s32 %s999_s16, %s1315_s20 }
   0xa   : > { %p810_p6 = scmp.ge.s32.totalorder %s1003_s17, 1  ;;  %p115_p7 = scmp.eq.s32.totalorder %s112_s23, 0 }
   0xb   : > { %p1078_p8 = por %p134_p5, %p133_p3  ;;  %p179_p9 = scmp.lt.s32.totalorder %s1003_s17, 3 }
   0xc   : > { %s1084_s25 = scalar_select %p115_p7, %s991_s14, %s117_s21  }
   0xd   : > { %p180_p10 = pnand %p810_p6, %p179_p9 }
   0xe   : > { %p216_p11 = scmp.lt.s32.totalorder (!%p180_p10), %s995_s15, 1  ;;  %s212_s18 = sand.u32 (!%p180_p10), 1, %s987_s13  }
   0xf   : > { %183 = sbr.rel (%p180_p10) target bundleno = 1384 (0x568), region = 32  ;;  %s811_s19 = sshll.u32 (!%p180_p10), %s212_s18, 4 }
  0x10   : > { %s830_s21 = sshll.u32 (!%p180_p10), %s995_s15, 4  ;;  %s214_s23 = scalar_lea.vmem (!%p180_p10), [#allocation2], %s811_s19 }
  0x11   : > { %s699_s28 = scalar_lea.hbm (!%p180_p10), %s1300_s3, %s830_s21  ;;  %s700_s29 = sshll.u32 (!%p180_p10), %s214_s23, 4  ;;  %s701_s29 = int_to_ptr.vmem [resolvable:$true] %s700_s29 }
  0x14   : > { %v1005_v0 = vmov 1   ;;  %v1006_v1 = vmov 0   ;;  %s1088_s26 = scalar_select %p216_p11, %s995_s15, 1  ;;  %v1007_v2 = vmov 2   ;;  %vm287_vm0 = vcmask 64512  }
  0x15   : > { %894 = vset.pattern.permute.xlu1 %v1005_v0  ;;  %893 = vset.pattern.permute.xlu0 %v1006_v1  ;;  %v285_v33 = vlaneseq  ;;  %s686_s15 = scalar_lea.sflag [#allocation3], %s212_s18 }
  0x16   : > { %895 = vset.pattern.permute.xlu2 %v1007_v2  ;;  %s829_s27 = sshll.u32 %s1088_s26, 4  ;;  %s814_s4 = sshll.u32 %s1088_s26, 2 }
  0x17   : > { %s223_s30 = scalar_lea.vmem %s1297_s0, %s829_s27  ;;  %s228_s7 = scalar_lea.vmem %s1298_s1, %s814_s4  ;;  %v1100_v34 = vand.u32 127, %v285_v33 }
  0x18   : > { %v234_v3 = vld [vmem:[%s223_s30] sm:$0xff]  ;;  %v235_v4 = vld [vmem:[%s223_s30 + $0x8] sm:$0xff]  ;;  %s815_s8 = sshll.u32 %s1088_s26, 3  ;;  %s702_s30 = sshll.u32 %s699_s28, 4  ;;  %s703_s30 = int_to_ptr.hbm [resolvable:$true] %s702_s30 }
  0x19   : > { %256 = vperm.xlu1 %894, %v234_v3   ;;  %240 = vperm.xlu0 %893, %v234_v3   ;;  %v236_v5 = vld [vmem:[%s228_s7] sm:$0x7]  ;;  %s232_s11 = scalar_lea.vmem %s1299_s2, %s815_s8  ;;  %s939_s4 = sshra.s32 %s703_s30, 4  ;;  %s940_s4 = int_to_ptr.hbm [resolvable:$true] %s939_s4 }
  0x1a   : > { %271 = vperm.xlu2 %895, %v234_v3   ;;  %v278_v6 = vperm.slane %v236_v5, 2  ;;  %v263_v8 = vperm.slane %v236_v5, 1  ;;  %v248_v9 = vperm.slane %v236_v5, 0  ;;  %s941_s5 = scalar_lea.hbm %s940_s4, 16  ;;  %s945_s8 = scalar_lea.hbm %s1300_s3, 32 }
  0x1b   : > { %p942_p12 = scmp.ne.s32.totalorder %s940_s4, %s941_s5  ;;  %p946_p1 = scmp.lt.s32.totalorder %s940_s4, %s1300_s3 }
  0x1c   : > { %p947_p2 = scmp.lt.s32.totalorder %s945_s8, %s941_s5 }
  0x1d   : > { %p943_p13 = pnand %p942_p12, %p1071_p4 }
  0x1e   : > { %p948_p3 = por %p947_p2, %p946_p1 }
  0x1f   : > { %p944_p0 = pneg %p943_p13 }
  0x21   : > { %260 = vperm.xlu1 %894, %v235_v4   ;;  %245 = vperm.xlu0 %893, %v235_v4   ;;  %p949_p5 = pnand %p948_p3, %p944_p0 }
  0x22   : > { %275 = vperm.xlu2 %895, %v235_v4  }
  0x29   : > { %896 = vset.pattern.permute.xlu0 %v1007_v2 }
  0x74   : > { %v272_v7 = vpop.permute.xlu2 %271 }
  0x75   : > { %v279_v10 = vsub.f32 %v272_v7, %v278_v6 }
  0x77   : > { %v281_v15 = vmul.f32 %v279_v10, %v279_v10 }
  0x7c   : > { %v276_v19 = vpop.permute.xlu2 %275 }
  0x7d   : > { %v280_v23 = vsub.f32 %v276_v19, %v278_v6 }
  0x7f   : > { %v282_v29 = vmul.f32 %v280_v23, %v280_v23 }
  0x8b   : > { %v257_v11 = vpop.permute.xlu1 %256  ;;  %v241_v12 = vpop.permute.xlu0 %240 }
  0x8c   : > { %v264_v13 = vsub.f32 %v257_v11, %v263_v8  ;;  %v249_v14 = vsub.f32 %v241_v12, %v248_v9 }
  0x8e   : > { %v266_v16 = vmul.f32 %v264_v13, %v264_v13  ;;  %v251_v17 = vmul.f32 %v249_v14, %v249_v14 }
  0x90   : > { %v268_v18 = vadd.f32 %v266_v16, %v251_v17 }
  0x92   : > { %v283_v20 = vadd.f32 %v281_v15, %v268_v18 }
  0x93   : > { %v261_v21 = vpop.permute.xlu1 %260  ;;  %v246_v22 = vpop.permute.xlu0 %245 }
  0x94   : > { %v265_v24 = vsub.f32 %v261_v21, %v263_v8  ;;  %v250_v25 = vsub.f32 %v246_v22, %v248_v9  ;;  %v288_v26 = vsel %vm287_vm0, %v283_v20, inf }
  0x95   : > { %289 = vmin.xlane.f32.xlu0 %v288_v26 }
  0x96   : > { %v267_v27 = vmul.f32 %v265_v24, %v265_v24  ;;  %v252_v28 = vmul.f32 %v250_v25, %v250_v25 }
  0x98   : > { %v269_v30 = vadd.f32 %v267_v27, %v252_v28 }
  0x9a   : > { %v284_v31 = vadd.f32 %v282_v29, %v269_v30 }
  0x9c   : > { %v291_v32 = vsel %vm287_vm0, %v284_v31, inf }
  0x9d   : > { %292 = vmin.xlane.f32.xlu1 %v291_v32 }
 0x108   : > { %v1102_v35 = vpop.xlane.xlu0 %289 }
 0x109   : > { %vm294_vm1 = vcmp.le.f32.partialorder %v283_v20, %v1102_v35  ;;  %v334_v21 = vmax.f32 %v1102_v35, 0.0 }
 0x10a   : > { %v296_v36 = vsel %vm294_vm1, %v1100_v34, 8 }
 0x10b   : > { %v298_v37 = vsel %vm287_vm0, %v296_v36, 2147483647  ;;  %897 = vrsqrt.f32 %v334_v21  ;;  %vm343_vm11 = vcmp.eq.f32.partialorder %v334_v21, inf  ;;  %vm345_vm12 = vcmp.eq.f32.partialorder %v334_v21, 0.0 }
 0x10c   : > { %v300_v38 = vshra.s32 %v298_v37, 16  ;;  %v299_v45 = vand.u32 65535, %v298_v37 }
 0x10e   : > { %v302_v39 = vcvt.s32.f32 %v300_v38  ;;  %v301_v47 = vcvt.s32.f32 %v299_v45 }
 0x110   : > { %v1107_v40 = vpop.xlane.xlu1 %292  ;;  %303 = vmin.xlane.f32.xlu2 %v302_v39 }
 0x111   : > { %vm295_vm2 = vcmp.le.f32.partialorder %v284_v31, %v1107_v40  ;;  %v335_v23 = vmax.f32 %v1107_v40, 0.0  ;;  %v898_v24 = vpop.eup %897 }
 0x112   : > { %v297_v41 = vsel %vm295_vm2, %v1100_v34, 8  ;;  %v337_v27 = vmul.f32 %v898_v24, %v334_v21 }
 0x113   : > { %v313_v42 = vsel %vm287_vm0, %v297_v41, 2147483647  ;;  %vm355_vm15 = vcmp.eq.f32.partialorder %v335_v23, inf  ;;  %vm357_vm1 = vcmp.eq.f32.partialorder %v335_v23, 0.0 }
 0x114   : > { %v315_v43 = vshra.s32 %v313_v42, 16  ;;  %v314_v49 = vand.u32 65535, %v313_v42  ;;  %v338_v29 = vmul.f32 %v898_v24, %v337_v27 }
 0x116   : > { %v317_v44 = vcvt.s32.f32 %v315_v43  ;;  %v316_v51 = vcvt.s32.f32 %v314_v49  ;;  %v339_v33 = vmul.f32 0.5, %v338_v29 }
 0x118   : > { %318 = vmin.xlane.f32.xlu2 %v317_v44  ;;  %v340_v38 = vsub.f32 1.5, %v339_v33 }
 0x11a   : > { %v341_v40 = vmul.f32 %v898_v24, %v340_v38 }
 0x183   : > { %v304_v46 = vpop.xlane.xlu2 %303 }
 0x184   : > { %vm305_vm3 = vcmp.eq.f32.partialorder %v302_v39, %v304_v46  ;;  %v310_v53 = vcvt.f32.s32 %v304_v46  ;;  %v342_v46 = vmul.f32 %v341_v40, %v334_v21 }
 0x185   : > { %v306_v48 = vsel %vm305_vm3, %v301_v47, inf }
 0x186   : > { %307 = vmin.xlane.f32.xlu0 %v306_v48  ;;  %v311_v55 = vshll.u32 %v310_v53, 16 }
 0x18b   : > { %v319_v50 = vpop.xlane.xlu2 %318 }
 0x18c   : > { %vm320_vm4 = vcmp.eq.f32.partialorder %v317_v44, %v319_v50  ;;  %v325_v58 = vcvt.f32.s32 %v319_v50 }
 0x18d   : > { %v321_v52 = vsel %vm320_vm4, %v316_v51, inf  ;;  %v344_v51 = vsel %vm343_vm11, %v334_v21, %v342_v46 }
 0x18e   : > { %322 = vmin.xlane.f32.xlu1 %v321_v52  ;;  %v326_v62 = vshll.u32 %v325_v58, 16  ;;  %v346_v52 = vand.u32 2147483648, %v334_v21 }
 0x190   : > { %v347_v53 = vsel %vm345_vm12, %v346_v52, %v344_v51 }
 0x1f9   : > { %v308_v54 = vpop.xlane.xlu0 %307 }
 0x1fa   : > { %v309_v56 = vcvt.f32.s32 %v308_v54 }
 0x1fc   : > { %v1112_v57 = vadd.s32 %v311_v55, %v309_v56 }
 0x1fe   : > { %vm328_vm5 = vcmp.eq.s32.totalorder %v1100_v34, %v1112_v57 }
 0x1ff   : > { %v1119_v59 = vsel %vm328_vm5, 3e+38, %v283_v20 }
 0x200   : > { %v400_v60 = vsel %vm287_vm0, %v1119_v59, inf }
 0x201   : > { %v323_v61 = vpop.xlane.xlu1 %322  ;;  %401 = vmin.xlane.f32.xlu2 %v400_v60  ;;  %v360_v60 = vadd.f32 1e-08, %v347_v53 }
 0x202   : > { %v324_v63 = vcvt.f32.s32 %v323_v61 }
 0x203   : > { %v371_v27 = vand.u32 2147483647, %v360_v60 }
 0x204   : > { %v1123_v0 = vadd.s32 %v326_v62, %v324_v63 }
 0x205   : > { %vm372_vm11 = vcmp.eq.f32.partialorder %v371_v27, 8.507059e+37 }
 0x206   : > { %vm329_vm6 = vcmp.eq.s32.totalorder %v1100_v34, %v1123_v0 }
 0x207   : > { %v1130_v1 = vsel %vm329_vm6, 3e+38, %v284_v31 }
 0x208   : > { %v403_v2 = vsel %vm287_vm0, %v1130_v1, inf }
 0x209   : > { %404 = vmin.xlane.f32.xlu0 %v403_v2  ;;  %v358_v2 = vand.u32 2147483648, %v335_v23 }
 0x274   : > { %v402_v3 = vpop.xlane.xlu2 %401 }
 0x275   : > { %vm406_vm7 = vcmp.le.f32.partialorder %v1119_v59, %v402_v3  ;;  %v446_v22 = vmax.f32 %v402_v3, 0.0 }
 0x276   : > { %v408_v4 = vsel %vm406_vm7, %v1100_v34, 8  ;;  %vm367_vm7 = vweird.f32 %v360_v60 }
 0x277   : > { %v410_v5 = vsel %vm287_vm0, %v408_v4, 2147483647  ;;  %899 = vrsqrt.f32 %v446_v22  ;;  %vm455_vm13 = vcmp.eq.f32.partialorder %v446_v22, inf  ;;  %v458_v58 = vand.u32 2147483648, %v446_v22 }
 0x278   : > { %v412_v6 = vshra.s32 %v410_v5, 16  ;;  %v411_v13 = vand.u32 65535, %v410_v5  ;;  %901 = vrsqrt.f32 %v335_v23  ;;  %vm457_vm14 = vcmp.eq.f32.partialorder %v446_v22, 0.0 }
 0x27a   : > { %v414_v7 = vcvt.s32.f32 %v412_v6  ;;  %v413_v15 = vcvt.s32.f32 %v411_v13 }
 0x27c   : > { %415 = vmin.xlane.f32.xlu1 %v414_v7  ;;  %v405_v8 = vpop.xlane.xlu0 %404 }
 0x27d   : > { %vm407_vm8 = vcmp.le.f32.partialorder %v1130_v1, %v405_v8  ;;  %v447_v25 = vmax.f32 %v405_v8, 0.0  ;;  %v900_v26 = vpop.eup %899 }
 0x27e   : > { %v409_v9 = vsel %vm407_vm8, %v1100_v34, 8  ;;  %v449_v28 = vmul.f32 %v900_v26, %v446_v22  ;;  %v902_v30 = vpop.eup %901 }
 0x27f   : > { %v425_v10 = vsel %vm287_vm0, %v409_v9, 2147483647  ;;  %903 = vrsqrt.f32 %v447_v25  ;;  %v349_v36 = vmul.f32 %v902_v30, %v335_v23  ;;  %vm467_vm2 = vcmp.eq.f32.partialorder %v447_v25, inf }
 0x280   : > { %v427_v11 = vshra.s32 %v425_v10, 16  ;;  %v426_v17 = vand.u32 65535, %v425_v10  ;;  %v450_v31 = vmul.f32 %v900_v26, %v449_v28  ;;  %905 = vrcp.f32 %v360_v60 }
 0x281   : > { %v350_v39 = vmul.f32 %v902_v30, %v349_v36  ;;  %v470_v6 = vand.u32 2147483648, %v447_v25  ;;  %vm469_vm3 = vcmp.eq.f32.partialorder %v447_v25, 0.0  ;;  %v373_v28 = vand.u32 2147483648, %v360_v60 }
 0x282   : > { %v429_v12 = vcvt.s32.f32 %v427_v11  ;;  %v428_v19 = vcvt.s32.f32 %v426_v17  ;;  %v451_v37 = vmul.f32 0.5, %v450_v31 }
 0x283   : > { %v351_v43 = vmul.f32 0.5, %v350_v39  ;;  %v374_v39 = vor.u32 1.1754944e-38, %v373_v28 }
 0x284   : > { %430 = vmin.xlane.f32.xlu2 %v429_v12  ;;  %v452_v41 = vsub.f32 1.5, %v451_v37 }
 0x285   : > { %v904_v32 = vpop.eup %903  ;;  %v352_v47 = vsub.f32 1.5, %v351_v43 }
 0x286   : > { %v461_v35 = vmul.f32 %v904_v32, %v447_v25  ;;  %v453_v44 = vmul.f32 %v900_v26, %v452_v41  ;;  %v906_v9 = vpop.eup %905 }
 0x287   : > { %v353_v50 = vmul.f32 %v902_v30, %v352_v47  ;;  %vm368_vm4 = vweird.f32 %v906_v9 }
 0x288   : > { %v462_v42 = vmul.f32 %v904_v32, %v461_v35  ;;  %v454_v48 = vmul.f32 %v453_v44, %v446_v22  ;;  %vm1163_vm8 = vmor %vm367_vm7, %vm368_vm4 }
 0x289   : > { %v354_v56 = vmul.f32 %v353_v50, %v335_v23 }
 0x28a   : > { %v463_v45 = vmul.f32 0.5, %v462_v42  ;;  %v456_v55 = vsel %vm455_vm13, %v446_v22, %v454_v48  ;;  %v1008_v42 = vmov 0.0  }
 0x28b   : > { %v459_v61 = vsel %vm457_vm14, %v458_v58, %v456_v55  ;;  %v356_v63 = vsel %vm355_vm15, %v335_v23, %v354_v56  ;;  %v816_v40 = vsel %vm328_vm5, 1.0, %v1008_v42 }
 0x28c   : > { %v464_v49 = vsub.f32 1.5, %v463_v45  ;;  %v472_v3 = vadd.f32 1e-08, %v459_v61  ;;  %v359_v4 = vsel %vm357_vm1, %v358_v2, %v356_v63 }
 0x28e   : > { %v465_v54 = vmul.f32 %v904_v32, %v464_v49  ;;  %907 = vrcp.f32 %v472_v3  ;;  %v485_v37 = vand.u32 2147483648, %v472_v3 }
 0x290   : > { %v466_v62 = vmul.f32 %v465_v54, %v447_v25  ;;  %v486_v47 = vor.u32 1.1754944e-38, %v485_v37 }
 0x292   : > { %v468_v5 = vsel %vm467_vm2, %v447_v25, %v466_v62 }
 0x293   : > { %v471_v8 = vsel %vm469_vm3, %v470_v6, %v468_v5  ;;  %v817_v6 = vsel %vm329_vm6, 1.0, %v1008_v42 }
 0x294   : > { %v1150_v10 = vadd.f32 1e-08, %v471_v8  ;;  %v908_v11 = vpop.eup %907 }
 0x295   : > { %v475_v13 = vmul.f32 %v908_v11, %v472_v3 }
 0x296   : > { %vm494_vm2 = vweird.f32 %v1150_v10  ;;  %v498_v63 = vand.u32 2147483647, %v1150_v10 }
 0x297   : > { %v476_v17 = vsub.f32 1.0, %v475_v13 }
 0x299   : > { %v477_v22 = vmul.f32 %v908_v11, %v476_v17 }
 0x29b   : > { %v478_v30 = vadd.f32 %v908_v11, %v477_v22 }
 0x2ef   : > { %v1140_v14 = vpop.xlane.xlu1 %415 }
 0x2f0   : > { %vm417_vm9 = vcmp.eq.f32.partialorder %v414_v7, %v1140_v14  ;;  %v1148_v7 = vadd.f32 1e-08, %v359_v4  ;;  %v422_v26 = vcvt.f32.s32 %v1140_v14  ;;  %v483_v14 = vand.u32 2147483647, %v472_v3 }
 0x2f1   : > { %v418_v16 = vsel %vm417_vm9, %v413_v15, inf  ;;  %vm480_vm9 = vweird.f32 %v908_v11 }
 0x2f2   : > { %419 = vmin.xlane.f32.xlu0 %v418_v16  ;;  %909 = vrcp.f32 %v1148_v7  ;;  %v423_v35 = vshll.u32 %v422_v26, 16  ;;  %vm382_vm13 = vweird.f32 %v1148_v7  ;;  %vm484_vm5 = vcmp.eq.f32.partialorder %v483_v14, 8.507059e+37 }
 0x2f3   : > { %911 = vrcp.f32 %v1150_v10  ;;  %v388_v56 = vand.u32 2147483648, %v1148_v7 }
 0x2f7   : > { %v1143_v18 = vpop.xlane.xlu2 %430 }
 0x2f8   : > { %vm432_vm10 = vcmp.eq.f32.partialorder %v429_v12, %v1143_v18  ;;  %v363_v12 = vmul.f32 %v906_v9, %v360_v60  ;;  %v1154_v16 = vpop.eup %909  ;;  %v437_v49 = vcvt.f32.s32 %v1143_v18  ;;  %v386_v18 = vand.u32 2147483647, %v1148_v7 }
 0x2f9   : > { %v433_v20 = vsel %vm432_vm10, %v428_v19, inf  ;;  %v1156_v19 = vpop.eup %911  ;;  %v378_v21 = vmul.f32 %v1154_v16, %v1148_v7  ;;  %vm479_vm10 = vweird.f32 %v472_v3  ;;  %vm383_vm14 = vweird.f32 %v1154_v16 }
 0x2fa   : > { %434 = vmin.xlane.f32.xlu1 %v433_v20  ;;  %v364_v15 = vsub.f32 1.0, %v363_v12  ;;  %v490_v23 = vmul.f32 %v1156_v19, %v1150_v10  ;;  %vm1170_vm12 = vmor %vm479_vm10, %vm480_vm9  ;;  %vm495_vm1 = vweird.f32 %v1156_v19  ;;  %v438_v61 = vshll.u32 %v437_v49, 16 }
 0x2fb   : > { %v379_v25 = vsub.f32 1.0, %v378_v21  ;;  %v482_v44 = vsel %vm1170_vm12, %v908_v11, %v478_v30  ;;  %vm1205_vm3 = vmor %vm382_vm13, %vm383_vm14  ;;  %v389_v7 = vor.u32 1.1754944e-38, %v388_v56  ;;  %vm387_vm7 = vcmp.eq.f32.partialorder %v386_v18, 8.507059e+37 }
 0x2fc   : > { %v365_v20 = vmul.f32 %v906_v9, %v364_v15  ;;  %v491_v31 = vsub.f32 1.0, %v490_v23  ;;  %v1189_v50 = vsel %vm484_vm5, %v486_v47, %v482_v44  ;;  %vm496_vm4 = vmor %vm494_vm2, %vm495_vm1  ;;  %vm499_vm9 = vcmp.eq.f32.partialorder %v498_v63, 8.507059e+37 }
 0x2fd   : > { %v380_v33 = vmul.f32 %v1154_v16, %v379_v25 }
 0x2fe   : > { %v366_v24 = vadd.f32 %v906_v9, %v365_v20  ;;  %v492_v45 = vmul.f32 %v1156_v19, %v491_v31 }
 0x2ff   : > { %v381_v48 = vadd.f32 %v1154_v16, %v380_v33 }
 0x300   : > { %v370_v32 = vsel %vm1163_vm8, %v906_v9, %v366_v24  ;;  %v493_v55 = vadd.f32 %v1156_v19, %v492_v45 }
 0x301   : > { %v1181_v46 = vsel %vm372_vm11, %v374_v39, %v370_v32  ;;  %v385_v3 = vsel %vm1205_vm3, %v1154_v16, %v381_v48 }
 0x302   : > { %v392_v57 = vmul.f32 %v816_v40, %v1181_v46  ;;  %v497_v5 = vsel %vm496_vm4, %v1156_v19, %v493_v55  ;;  %v1221_v9 = vsel %vm387_vm7, %v389_v7, %v385_v3 }
 0x303   : > { %v393_v13 = vmul.f32 %v817_v6, %v1221_v9 }
 0x365   : > { %v420_v36 = vpop.xlane.xlu0 %419 }
 0x366   : > { %v421_v38 = vcvt.f32.s32 %v420_v36 }
 0x368   : > { %v424_v43 = vadd.s32 %v423_v35, %v421_v38 }
 0x36a   : > { %vm440_vm15 = vcmp.eq.s32.totalorder %v1100_v34, %v424_v43 }
 0x36b   : > { %v510_v51 = vsel %vm440_vm15, 3e+38, %v1119_v59  ;;  %v818_v52 = vsel %vm440_vm15, 1.0, %v1008_v42  ;;  %v500_v59 = vand.u32 2147483648, %v1150_v10 }
 0x36c   : > { %v512_v53 = vsel %vm287_vm0, %v510_v51, inf  ;;  %v504_v54 = vmul.f32 %v818_v52, %v1189_v50 }
 0x36d   : > { %v435_v58 = vpop.xlane.xlu1 %434  ;;  %513 = vmin.xlane.f32.xlu2 %v512_v53  ;;  %v501_v8 = vor.u32 1.1754944e-38, %v500_v59  ;;  %v237_v59 = vld [vmem:[%s232_s11] sm:$0xff] }
 0x36e   : > { %v436_v62 = vcvt.f32.s32 %v435_v58  ;;  %v1210_v2 = vadd.f32 %v504_v54, %v392_v57  ;;  %643 = vmatpush.msra.mxu0 %v237_v59  ;;  %831 = vmatpush.msra.mxu1 %v237_v59 }
 0x36f   : > { %v1223_v10 = vsel %vm499_vm9, %v501_v8, %v497_v5 }
 0x370   : > { %v439_v4 = vadd.s32 %v438_v61, %v436_v62 }
 0x372   : > { %vm441_vm8 = vcmp.eq.s32.totalorder %v1100_v34, %v439_v4 }
 0x373   : > { %v511_v11 = vsel %vm441_vm8, 3e+38, %v1130_v1  ;;  %v819_v12 = vsel %vm441_vm8, 1.0, %v1008_v42 }
 0x374   : > { %v515_v15 = vsel %vm287_vm0, %v511_v11, inf  ;;  %v505_v0 = vmul.f32 %v819_v12, %v1223_v10 }
 0x375   : > { %516 = vmin.xlane.f32.xlu0 %v515_v15 }
 0x376   : > { %v1230_v16 = vadd.f32 %v505_v0, %v393_v13 }
 0x3e0   : > { %v514_v17 = vpop.xlane.xlu2 %513 }
 0x3e1   : > { %vm518_vm6 = vcmp.le.f32.partialorder %v510_v51, %v514_v17  ;;  %v558_v37 = vmax.f32 %v514_v17, 0.0 }
 0x3e2   : > { %v520_v19 = vsel %vm518_vm6, %v1100_v34, 8 }
 0x3e3   : > { %v522_v20 = vsel %vm287_vm0, %v520_v19, 2147483647  ;;  %913 = vrsqrt.f32 %v558_v37  ;;  %vm567_vm13 = vcmp.eq.f32.partialorder %v558_v37, inf  ;;  %v570_v53 = vand.u32 2147483648, %v558_v37 }
 0x3e4   : > { %v524_v21 = vshra.s32 %v522_v20, 16  ;;  %v523_v27 = vand.u32 65535, %v522_v20  ;;  %vm569_vm14 = vcmp.eq.f32.partialorder %v558_v37, 0.0 }
 0x3e6   : > { %v526_v22 = vcvt.s32.f32 %v524_v21  ;;  %v525_v29 = vcvt.s32.f32 %v523_v27 }
 0x3e8   : > { %527 = vmin.xlane.f32.xlu1 %v526_v22  ;;  %v517_v1 = vpop.xlane.xlu0 %516 }
 0x3e9   : > { %vm519_vm10 = vcmp.le.f32.partialorder %v511_v11, %v517_v1  ;;  %v559_v35 = vmax.f32 %v517_v1, 0.0  ;;  %v914_v38 = vpop.eup %913 }
 0x3ea   : > { %v521_v23 = vsel %vm519_vm10, %v1100_v34, 8  ;;  %v561_v14 = vmul.f32 %v914_v38, %v558_v37 }
 0x3eb   : > { %v537_v24 = vsel %vm287_vm0, %v521_v23, 2147483647  ;;  %915 = vrsqrt.f32 %v559_v35  ;;  %vm579_vm15 = vcmp.eq.f32.partialorder %v559_v35, inf  ;;  %v582_v58 = vand.u32 2147483648, %v559_v35 }
 0x3ec   : > { %v539_v25 = vshra.s32 %v537_v24, 16  ;;  %v538_v31 = vand.u32 65535, %v537_v24  ;;  %v562_v39 = vmul.f32 %v914_v38, %v561_v14  ;;  %vm581_vm5 = vcmp.eq.f32.partialorder %v559_v35, 0.0 }
 0x3ee   : > { %v541_v26 = vcvt.s32.f32 %v539_v25  ;;  %v540_v33 = vcvt.s32.f32 %v538_v31  ;;  %v563_v40 = vmul.f32 0.5, %v562_v39 }
 0x3f0   : > { %542 = vmin.xlane.f32.xlu2 %v541_v26  ;;  %v564_v44 = vsub.f32 1.5, %v563_v40  ;;  %v509_v40 = vadd.f32 %v1223_v10, %v1221_v9 }
 0x3f1   : > { %v916_v41 = vpop.eup %915 }
 0x3f2   : > { %v573_v43 = vmul.f32 %v916_v41, %v559_v35  ;;  %v565_v47 = vmul.f32 %v914_v38, %v564_v44 }
 0x3f4   : > { %v574_v45 = vmul.f32 %v916_v41, %v573_v43  ;;  %v566_v49 = vmul.f32 %v565_v47, %v558_v37 }
 0x3f6   : > { %v575_v48 = vmul.f32 0.5, %v574_v45  ;;  %v568_v52 = vsel %vm567_vm13, %v558_v37, %v566_v49 }
 0x3f7   : > { %v571_v54 = vsel %vm569_vm14, %v570_v53, %v568_v52 }
 0x3f8   : > { %v576_v57 = vsub.f32 1.5, %v575_v48  ;;  %v584_v18 = vadd.f32 1e-08, %v571_v54 }
 0x3fa   : > { %v577_v51 = vmul.f32 %v916_v41, %v576_v57  ;;  %917 = vrcp.f32 %v584_v18  ;;  %v597_v12 = vand.u32 2147483648, %v584_v18  ;;  %vm591_vm2 = vweird.f32 %v584_v18 }
 0x3fb   : > { %v595_v0 = vand.u32 2147483647, %v584_v18 }
 0x3fc   : > { %v578_v55 = vmul.f32 %v577_v51, %v559_v35 }
 0x3fd   : > { %vm596_vm4 = vcmp.eq.f32.partialorder %v595_v0, 8.507059e+37 }
 0x3fe   : > { %v580_v56 = vsel %vm579_vm15, %v559_v35, %v578_v55 }
 0x3ff   : > { %v583_v60 = vsel %vm581_vm5, %v582_v58, %v580_v56 }
 0x400   : > { %v585_v61 = vadd.f32 1e-08, %v583_v60  ;;  %v918_v62 = vpop.eup %917 }
 0x401   : > { %v587_v63 = vmul.f32 %v918_v62, %v584_v18  ;;  %vm592_vm1 = vweird.f32 %v918_v62 }
 0x402   : > { %919 = vrcp.f32 %v585_v61  ;;  %vm593_vm3 = vmor %vm591_vm2, %vm592_vm1  ;;  %vm606_vm9 = vweird.f32 %v585_v61  ;;  %v612_v27 = vand.u32 2147483648, %v585_v61 }
 0x403   : > { %v588_v3 = vsub.f32 1.0, %v587_v63 }
 0x404   : > { %v613_v37 = vor.u32 1.1754944e-38, %v612_v27 }
 0x405   : > { %v589_v5 = vmul.f32 %v918_v62, %v588_v3 }
 0x407   : > { %v590_v8 = vadd.f32 %v918_v62, %v589_v5 }
 0x408   : > { %v920_v4 = vpop.eup %919 }
 0x409   : > { %v602_v6 = vmul.f32 %v920_v4, %v585_v61  ;;  %v594_v19 = vsel %vm593_vm3, %v918_v62, %v590_v8  ;;  %vm607_vm8 = vweird.f32 %v920_v4 }
 0x40a   : > { %vm608_vm6 = vmor %vm606_vm9, %vm607_vm8 }
 0x40b   : > { %v603_v11 = vsub.f32 1.0, %v602_v6 }
 0x40d   : > { %v604_v21 = vmul.f32 %v920_v4, %v603_v11 }
 0x45b   : > { %v528_v28 = vpop.xlane.xlu1 %527 }
 0x45c   : > { %vm529_vm11 = vcmp.eq.f32.partialorder %v526_v22, %v528_v28  ;;  %v534_v7 = vcvt.f32.s32 %v528_v28  ;;  %v598_v22 = vor.u32 1.1754944e-38, %v597_v12 }
 0x45d   : > { %v530_v30 = vsel %vm529_vm11, %v525_v29, inf }
 0x45e   : > { %531 = vmin.xlane.f32.xlu0 %v530_v30  ;;  %v535_v15 = vshll.u32 %v534_v7, 16  ;;  %v599_v23 = vsel %vm596_vm4, %v598_v22, %v594_v19  ;;  %v610_v30 = vand.u32 2147483647, %v585_v61 }
 0x460   : > { %vm611_vm10 = vcmp.eq.f32.partialorder %v610_v30, 8.507059e+37 }
 0x463   : > { %v1236_v32 = vpop.xlane.xlu2 %542 }
 0x464   : > { %vm544_vm12 = vcmp.eq.f32.partialorder %v541_v26, %v1236_v32  ;;  %v549_v1 = vcvt.f32.s32 %v1236_v32  ;;  %v605_v26 = vadd.f32 %v920_v4, %v604_v21 }
 0x465   : > { %v545_v36 = vsel %vm544_vm12, %v540_v33, inf }
 0x466   : > { %546 = vmin.xlane.f32.xlu1 %v545_v36  ;;  %v550_v29 = vshll.u32 %v549_v1, 16  ;;  %v609_v36 = vsel %vm608_vm6, %v920_v4, %v605_v26 }
 0x467   : > { %v614_v35 = vsel %vm611_vm10, %v613_v37, %v609_v36 }
 0x468   : > { %v621_v43 = vadd.f32 %v614_v35, %v509_v40 }
 0x46a   : > { %v677_v55 = vand.u32 2147483648, %v621_v43  ;;  %vm671_vm5 = vweird.f32 %v621_v43  ;;  %v675_v18 = vand.u32 2147483647, %v621_v43 }
 0x46c   : > { %v678_v58 = vor.u32 1.1754944e-38, %v677_v55  ;;  %vm676_vm2 = vcmp.eq.f32.partialorder %v675_v18, 8.507059e+37 }
 0x4d1   : > { %v532_v13 = vpop.xlane.xlu0 %531 }
 0x4d2   : > { %v533_v17 = vcvt.f32.s32 %v532_v13 }
 0x4d4   : > { %v536_v20 = vadd.s32 %v535_v15, %v533_v17 }
 0x4d6   : > { %vm552_vm7 = vcmp.eq.s32.totalorder %v1100_v34, %v536_v20 }
 0x4d7   : > { %v820_v24 = vsel %vm552_vm7, 1.0, %v1008_v42 }
 0x4d8   : > { %v616_v25 = vmul.f32 %v820_v24, %v599_v23 }
 0x4d9   : > { %v547_v28 = vpop.xlane.xlu1 %546 }
 0x4da   : > { %v548_v31 = vcvt.f32.s32 %v547_v28  ;;  %v618_v33 = vadd.f32 %v616_v25, %v1210_v2  ;;  %v508_v2 = vadd.f32 %v1189_v50, %v1181_v46 }
 0x4dc   : > { %v551_v32 = vadd.s32 %v550_v29, %v548_v31  ;;  %822 = vmatmul.msk.f32.vlgmr.msra.gmra.mxu0 %vm287_vm0, %v618_v33  ;;  %v620_v41 = vadd.f32 %v599_v23, %v508_v2 }
 0x4de   : > { %vm553_vm11 = vcmp.eq.s32.totalorder %v1100_v34, %v551_v32  ;;  %921 = vrcp.f32 %v620_v41  ;;  %v662_v46 = vand.u32 2147483648, %v620_v41  ;;  %vm656_vm12 = vweird.f32 %v620_v41 }
 0x4df   : > { %v821_v38 = vsel %vm553_vm11, 1.0, %v1008_v42  ;;  %923 = vrcp.f32 %v621_v43  ;;  %v660_v50 = vand.u32 2147483647, %v620_v41 }
 0x4e0   : > { %v617_v14 = vmul.f32 %v821_v38, %v614_v35  ;;  %v663_v57 = vor.u32 1.1754944e-38, %v662_v46 }
 0x4e1   : > { %vm661_vm14 = vcmp.eq.f32.partialorder %v660_v50, 8.507059e+37 }
 0x4e2   : > { %v619_v39 = vadd.f32 %v617_v14, %v1230_v16 }
 0x4e4   : > { %823 = vmatmul.msk.f32.vlgmr.msra.gmra.mxu1 %vm287_vm0, %v619_v39  ;;  %v922_v34 = vpop.eup %921 }
 0x4e5   : > { %v652_v44 = vmul.f32 %v922_v34, %v620_v41  ;;  %v924_v45 = vpop.eup %923  ;;  %vm657_vm0 = vweird.f32 %v922_v34 }
 0x4e6   : > { %v667_v16 = vmul.f32 %v924_v45, %v621_v43  ;;  %vm658_vm13 = vmor %vm656_vm12, %vm657_vm0  ;;  %vm672_vm15 = vweird.f32 %v924_v45 }
 0x4e7   : > { %v653_v42 = vsub.f32 1.0, %v652_v44  ;;  %vm673_vm1 = vmor %vm671_vm5, %vm672_vm15 }
 0x4e8   : > { %v668_v49 = vsub.f32 1.0, %v667_v16 }
 0x4e9   : > { %v654_v47 = vmul.f32 %v922_v34, %v653_v42 }
 0x4ea   : > { %v669_v10 = vmul.f32 %v924_v45, %v668_v49 }
 0x4eb   : > { %v655_v48 = vadd.f32 %v922_v34, %v654_v47 }
 0x4ec   : > { %v670_v54 = vadd.f32 %v924_v45, %v669_v10 }
 0x4ed   : > { %v659_v9 = vsel %vm658_vm13, %v922_v34, %v655_v48 }
 0x4ee   : > { %v664_v52 = vsel %vm661_vm14, %v663_v57, %v659_v9  ;;  %v674_v56 = vsel %vm673_vm1, %v924_v45, %v670_v54 }
 0x4ef   : > { %v679_v60 = vsel %vm676_vm2, %v678_v58, %v674_v56 }
 0x559   : > { %v645_v51 = vpop.f32.mrf.mxu0 }
 0x55a   : > { %v681_v53 = vmul.f32 %v664_v52, %v645_v51 }
 0x55c   : > { %683 = vst [vmem:[%s214_s23] sm:$0xff] %v681_v53 }
 0x561   : > { %v648_v59 = vpop.f32.mrf.mxu1 }
 0x562   : > { %v682_v61 = vmul.f32 %v679_v60, %v648_v59 }
 0x564   : > { %684 = vst [vmem:[%s214_s23 + $0x8] sm:$0xff] %v682_v61 }
 0x565   : > { %952 = shalt.err (!%p949_p5)
}
 0x566   : > { %s1009_s11 = smov 128   ;;  %s1010_s18 = smov 8  }
 0x567   : > { %832 = dma.vmem_to_hbm [thread:$0]  (%p1071_p4), %s701_s29, 256, %s703_s30, %s686_s15, %s1009_s11, %s1009_s11, %s1010_s18  }
 0x568 PF: > { %p838_p6 = scmp.ge.s32.totalorder %s1003_s17, 2  ;;  %s717_s19 = sand.u32 1, %s983_s12  }
 0x569   : > { %s718_s21 = scalar_lea.sflag [#allocation3], %s717_s19 }
 0x56a   : > { %p835_p7 = pnand %p838_p6, %p1078_p8 }
 0x56c   : > { %p836_p9 = pneg %p835_p7 }
 0x56e   : > { %978 = dma.done.wait (%p836_p9), %s718_s21, 256  }
 0x56f   : > { %980 = vsyncadd (%p836_p9), %s718_s21, 4294967040  ;;  %s16_s17 = sadd.s32 1, %s1003_s17   ;;  %s1309_s12 = smov %s987_s13 }
 0x570   : > { %p13_p10 = scmp.ge.s32.totalorder %s16_s17, 4   ;;  %s1310_s13 = smov %s991_s14 }
 0x571   : > { %s1311_s14 = smov %s1084_s25  ;;  %s1312_s15 = smov %s999_s16 }
 0x572   : > { %s1313_s16 = smov %s1315_s20  ;;  %15 = sbr.rel (!%p13_p10) target bundleno = 4 (0x4), region = 73 }
 0x577   :  { %724 = vsyncpa [#allocation3], 1 }
 0x578   :  { %726 = vsyncpa [#allocation3 + $0x1], 1 }

</bundles_post_ra>
